<compile_context>
chip_gen: v7x
topology: tpu7x:2x2x1
jax: 0.10.0
libtpu: 0.0.40
codegen_flags: <defaults>
</compile_context>

<pallas_src>
import math

import jax
import jax.numpy as jnp
from jax.experimental import pallas as pl
from jax.experimental.pallas import tpu as pltpu

_SUBLANE = 8
_LANE = 128


def _affine_kernel(x_ref, w_ref, b_ref, o_ref):
    # x_ref: (tile_r, lane); w_ref / b_ref: (1, lane) broadcast over rows.
    o_ref[...] = x_ref[...] * w_ref[...] + b_ref[...]


def affine_net(x, weight, bias, *,
               target_tile_bytes=4 * 1024 * 1024,
               small_input_bytes=256 * 1024):
    """out = x * weight + bias; x: [..., hidden], weight/bias: [hidden]."""
    hidden = x.shape[-1]
    assert weight.shape == (hidden,) and bias.shape == (hidden,)
    orig_shape = x.shape
    dtype = x.dtype
    itemsize = jnp.dtype(dtype).itemsize

    # Matches module numerics for f32; note: downcasts params if x is lower precision.
    w = weight.astype(dtype)
    b = bias.astype(dtype)

    x2d = x.reshape(-1, hidden)
    rows = x2d.shape[0]

    # ---- tiny-input fallback: pallas launch/pipeline setup dominates here ----
    if rows * hidden * itemsize < small_input_bytes:
        return (x2d * w + b).reshape(orig_shape)

    # ---- generalized lane folding: lane = hidden * fold is a multiple of 128 ----
    fold = _LANE // math.gcd(hidden, _LANE)          # = lcm(hidden, 128) // hidden
    lane = hidden * fold
    if fold > 1 and lane * itemsize > 256 * 1024:    # pathological hidden: folded row
        fold, lane = 1, hidden                       # too large -> skip folding

    main_rows = (rows // fold) * fold
    folded_rows = main_rows // fold
    if folded_rows == 0:                             # fewer rows than one fold group
        return (x2d * w + b).reshape(orig_shape)

    # Main (folded) slab: pure reshape when rows % fold == 0 (no pad, no copy pass).
    x_main = x2d if main_rows == rows else x2d[:main_rows]
    x_folded = x_main.reshape(folded_rows, lane)
    w_row = jnp.tile(w, fold).reshape(1, lane)       # row-major fold replication
    b_row = jnp.tile(b, fold).reshape(1, lane)

    # ---- tile the folded row axis: big tiles, but keep >= ~8 grid steps ----
    row_bytes = lane * itemsize
    target_rows = max(_SUBLANE,
                      (target_tile_bytes // row_bytes) // _SUBLANE * _SUBLANE)
    rows_for_8_steps = (folded_rows // 8) // _SUBLANE * _SUBLANE
    if rows_for_8_steps >= _SUBLANE:
        target_rows = min(target_rows, rows_for_8_steps)
    tile_r = folded_rows if folded_rows <= target_rows else target_rows
    grid = (pl.cdiv(folded_rows, tile_r),)

    bytes_main = folded_rows * lane * itemsize
    out_folded = pl.pallas_call(
        _affine_kernel,
        out_shape=jax.ShapeDtypeStruct((folded_rows, lane), dtype),
        grid_spec=pltpu.PrefetchScalarGridSpec(
            num_scalar_prefetch=0,
            grid=grid,
            in_specs=[
                pl.BlockSpec((tile_r, lane), lambda i: (i, 0)),
                pl.BlockSpec((1, lane), lambda i: (0, 0)),   # VMEM-resident
                pl.BlockSpec((1, lane), lambda i: (0, 0)),   # VMEM-resident
            ],
            out_specs=pl.BlockSpec((tile_r, lane), lambda i: (i, 0)),
        ),
        compiler_params=pltpu.CompilerParams(
            dimension_semantics=("parallel",),
            vmem_limit_bytes=32 * 1024 * 1024,   # headroom on v5e for 4 MiB tiles
        ),
        cost_estimate=pl.CostEstimate(
            flops=2 * folded_rows * lane,
            transcendentals=0,
            bytes_accessed=2 * bytes_main,
        ),
    )(x_folded, w_row, b_row)

    out_main = out_folded.reshape(main_rows, hidden)
    if main_rows == rows:
        return out_main.reshape(orig_shape)

    # Ragged tail (< fold rows): tiny, plain jnp — no whole-array pad / un-pad passes.
    tail = x2d[main_rows:] * w + b
    return jnp.concatenate([out_main, tail], axis=0).reshape(orig_shape)


if __name__ == "__main__":
    key = jax.random.PRNGKey(0)
    k1, k2, k3, k4 = jax.random.split(key, 4)

    # --- 1) Module-scale shape (batch=2, seq=8, hidden=32): small-input fallback path.
    hidden_dim = 32
    weight = jnp.ones((hidden_dim,), dtype=jnp.float32)   # nn.Parameter(torch.ones)
    bias = jnp.zeros((hidden_dim,), dtype=jnp.float32)    # nn.Parameter(torch.zeros)
    x = jax.random.normal(k1, (2, 8, hidden_dim), dtype=jnp.float32)
    out = jax.block_until_ready(affine_net(x, weight, bias))
    assert out.shape == x.shape
    assert jnp.allclose(out, x * weight + bias, atol=1e-6)

    # --- 2) Larger shape: exercises the Pallas path (lane-folded, tiled, grid of 8).
    x_big = jax.random.normal(k2, (8, 1024, hidden_dim), dtype=jnp.float32)
    w2 = jnp.linspace(0.5, 1.5, hidden_dim, dtype=jnp.float32)
    b2 = jnp.linspace(-1.0, 1.0, hidden_dim, dtype=jnp.float32)
    out_big = jax.block_until_ready(affine_net(x_big, w2, b2))
    assert out_big.shape == x_big.shape
    assert jnp.allclose(out_big, x_big * w2 + b2, atol=1e-6)

    # --- 3) Ragged row count (4097 rows, fold=4): main folded slab + jnp tail path.
    x_rag = jax.random.normal(k3, (1, 4097, hidden_dim), dtype=jnp.float32)
    out_rag = jax.block_until_ready(affine_net(x_rag, w2, b2))
    assert out_rag.shape == x_rag.shape
    assert jnp.allclose(out_rag, x_rag * w2 + b2, atol=1e-6)

    # --- 4) hidden=160 (>128, not a multiple of 128): generalized folding (lane=640).
    h2 = 160
    w3 = jnp.linspace(-0.5, 2.0, h2, dtype=jnp.float32)
    b3 = jnp.linspace(1.0, -1.0, h2, dtype=jnp.float32)
    x_160 = jax.random.normal(k4, (4, 512, h2), dtype=jnp.float32)
    out_160 = jax.block_until_ready(affine_net(x_160, w3, b3))
    assert out_160.shape == x_160.shape
    assert jnp.allclose(out_160, x_160 * w3 + b3, atol=1e-6)

    print("KERNEL_OK")
</pallas_src>

<mosaic_0001>
module attributes {stable_mosaic.version = 11 : i64} {
  func.func @_affine_kernel(%arg0: i32, %arg1: memref<256x128xf32, #tpu.memory_space<vmem>>, %arg2: memref<1x128xf32, #tpu.memory_space<vmem>>, %arg3: memref<1x128xf32, #tpu.memory_space<vmem>>, %arg4: memref<256x128xf32, #tpu.memory_space<vmem>>) attributes {dimension_semantics = [#tpu.dimension_semantics<parallel>], iteration_bounds = array<i64: 8>, scalar_prefetch = 0 : i64, scratch_operands = 0 : i64, tpu.core_type = #tpu.core_type<tc>, window_params = [{transform_indices = @transform_0, window_bounds = array<i64: 256, 128>}, {pipeline_mode = #tpu.pipeline_mode<synchronous>, transform_indices = @transform_1, window_bounds = array<i64: 1, 128>}, {pipeline_mode = #tpu.pipeline_mode<synchronous>, transform_indices = @transform_2, window_bounds = array<i64: 1, 128>}, {transform_indices = @transform_3, window_bounds = array<i64: 256, 128>}]} {
    %c0 = arith.constant 0 : index
    %c0_0 = arith.constant 0 : index
    %0 = vector.load %arg1[%c0, %c0_0] : memref<256x128xf32, #tpu.memory_space<vmem>>, vector<256x128xf32>
    %c0_1 = arith.constant 0 : index
    %c0_2 = arith.constant 0 : index
    %1 = vector.load %arg2[%c0_1, %c0_2] : memref<1x128xf32, #tpu.memory_space<vmem>>, vector<1x128xf32>
    %2 = vector.broadcast %1 : vector<1x128xf32> to vector<256x128xf32>
    %3 = arith.mulf %0, %2 : vector<256x128xf32>
    %c0_3 = arith.constant 0 : index
    %c0_4 = arith.constant 0 : index
    %4 = vector.load %arg3[%c0_3, %c0_4] : memref<1x128xf32, #tpu.memory_space<vmem>>, vector<1x128xf32>
    %5 = vector.broadcast %4 : vector<1x128xf32> to vector<256x128xf32>
    %6 = arith.addf %3, %5 : vector<256x128xf32>
    %c0_5 = arith.constant 0 : index
    %c0_6 = arith.constant 0 : index
    %7 = vector.load %arg4[%c0_5, %c0_6] : memref<256x128xf32, #tpu.memory_space<vmem>>, vector<256x128xf32>
    tpu.vector_store %arg4[%c0_5, %c0_6], %6 {strides = array<i32>} : memref<256x128xf32, #tpu.memory_space<vmem>>, vector<256x128xf32>,
    return
  }
  func.func @transform_0(%arg0: i32) -> (i32, i32) {
    %c0_i32 = arith.constant 0 : i32
    %c0_i32_0 = arith.constant 0 : i32
    return %arg0, %c0_i32 : i32, i32
  }
  func.func @transform_1(%arg0: i32) -> (i32, i32) {
    %c0_i32 = arith.constant 0 : i32
    %c0_i32_0 = arith.constant 0 : i32
    %c0_i32_1 = arith.constant 0 : i32
    return %c0_i32, %c0_i32_0 : i32, i32
  }
  func.func @transform_2(%arg0: i32) -> (i32, i32) {
    %c0_i32 = arith.constant 0 : i32
    %c0_i32_0 = arith.constant 0 : i32
    %c0_i32_1 = arith.constant 0 : i32
    return %c0_i32, %c0_i32_0 : i32, i32
  }
  func.func @transform_3(%arg0: i32) -> (i32, i32) {
    %c0_i32 = arith.constant 0 : i32
    %c0_i32_0 = arith.constant 0 : i32
    return %arg0, %c0_i32 : i32, i32
  }
}

</mosaic_0001>

<bundles_post_ra>
// kernel: tpu_custom_call.1
= control target key start
LH: loop header
LB: loop body
LE: loop exit
PB: predicated region body
PF: predicated region fallthrough
CT: control target
= control target key end

     0   :  { %8 = vsyncpa [#allocation3], 0  ;;  %s919_s0 = inlined_call_operand.hbm [shape: f32[2048,128], index: 0, kind: input, shape index: {}]   ;;  %s920_s1 = inlined_call_operand.vmem [shape: f32[1,128], index: 1, kind: input, shape index: {}]   ;;  %s921_s2 = inlined_call_operand.vmem [shape: f32[1,128], index: 2, kind: input, shape index: {}]   ;;  %s922_s3 = inlined_call_operand.hbm [shape: f32[2048,128], index: 3, kind: output, shape index: {}]  }
   0x1   :  { %10 = vsyncpa [#allocation3 + $0x1], 0 }
   0x2   :  { %11 = vsyncpa [#allocation4], 0 }
   0x3   :  { %13 = vsyncpa [#allocation4 + $0x1], 0  ;;  %s612_s12 = smov 0   ;;  %s614_s13 = smov 0  }
   0x4   :  { %s616_s14 = smov 0   ;;  %s618_s15 = smov 0  }
   0x5 LB: > { %s633_s16 = sadd.s32 4294967295, %s584_s15   ;;  %s420_s17 = sadd.s32 4294967294, %s584_s15   ;;  %s584_s15 = sphi %s618_s15, %s934_s15   ;;  %s580_s14 = sphi %s616_s14, %s933_s14   ;;  %s576_s13 = sphi %s614_s13, %s932_s13   ;;  %s572_s12 = sphi %s612_s12, %s931_s12  }
   0x6   : > { %s637_s18 = sadd.s32 1, %s584_s15   ;;  %s26_s19 = sadd.s32 1, %s580_s14 }
   0x7   : > { %s23_s20 = ssub.s32 %s584_s15, %s637_s18  ;;  %p33_p0 = scmp.ne.s32.totalorder %s580_s14, %s576_s13 }
   0x8   : > { %p24_p1 = scmp.eq.s32.totalorder %s23_s20, 0  ;;  %p34_p2 = scmp.eq.s32.totalorder %s584_s15, 0 }
   0x9   : > { %p39_p3 = scmp.ne.s32.totalorder %s576_s13, %s572_s12  ;;  %p40_p4 = scmp.eq.s32.totalorder %s633_s16, 0 }
   0xa   : > { %s649_s21 = scalar_select %p24_p1, %s580_s14, %s26_s19  }
   0xb   : > { %p651_p5 = por %p34_p2, %p33_p0  ;;  %p655_p6 = por %p40_p4, %p39_p3 }
   0xc   : > { %p105_p7 = scmp.eq.s32.totalorder %s633_s16, 7  ;;  %p111_p8 = scmp.eq.s32.totalorder %s420_s17, 7 }
   0xd   : > { %p450_p9 = scmp.lt.s32.totalorder %s584_s15, 8  ;;  %s137_s26 = sand.u32 1, %s580_s14  }
   0xe   : > { %p661_p10 = por %p105_p7, %p33_p0  ;;  %p665_p11 = por %p111_p8, %p39_p3 }
   0xf   : > { %s436_s27 = sshll.u32 %s584_s15, 12  ;;  %s423_s28 = sshll.u32 %s137_s26, 8 }
  0x10   : > { %s926_s24 = scalar_select %p661_p10, 1, 0 }
  0x11   : > { %s927_s25 = scalar_select %p665_p11, 1, 0 }
  0x12   : > { %s674_s4 = scalar_lea.hbm %s919_s0, %s436_s27  ;;  %s141_s5 = scalar_lea.vmem [#allocation2], %s423_s28 }
  0x13   : > { %s148_s6 = sshll.u32 %s141_s5, 4  ;;  %p678_p12 = pnand %p450_p9, %p651_p5  ;;  %s682_s6 = int_to_ptr.vmem [resolvable:$true] %s148_s6 }
  0x14   : > { %s684_s8 = scalar_lea.sflag [#allocation3], %s137_s26  ;;  %s488_s9 = scalar_lea.hbm %s674_s4, 4096 }
  0x15   : > { %p489_p13 = scmp.ne.s32.totalorder %s674_s4, %s488_s9  ;;  %p490_p0 = pneg %p678_p12 }
  0x16   : > { %s493_s17 = scalar_lea.hbm %s919_s0, 32768  ;;  %p494_p3 = scmp.lt.u32.totalorder %s674_s4, %s919_s0 }
  0x17   : > { %p491_p1 = pnand %p490_p0, %p489_p13  ;;  %p495_p4 = scmp.lt.u32.totalorder %s493_s17, %s488_s9 }
  0x18   : > { %p497_p7 = scmp.lt.u32.totalorder %s488_s9, %s674_s4 }
  0x19   : > { %p492_p2 = pneg %p491_p1  ;;  %p496_p5 = por %p495_p4, %p494_p3 }
  0x1b   : > { %p498_p8 = por %p497_p7, %p496_p5 }
  0x1d   : > { %p499_p9 = pnand %p498_p8, %p492_p2 }
  0x1f   : > { %502 = shalt.err (!%p499_p9)
}
  0x20   : > { %s503_s22 = scalar_lea.vmem %s682_s6, 4096  ;;  %s586_s26 = smov [#allocation2]  }
  0x21   : > { %p504_p13 = scmp.ne.s32.totalorder %s682_s6, %s503_s22  ;;  %s508_s27 = sshll.u32 %s586_s26, 4  ;;  %s509_s27 = int_to_ptr.vmem [resolvable:$false] %s508_s27 }
  0x22   : > { %s510_s28 = scalar_lea.vmem %s509_s27, 8192  ;;  %p511_p10 = scmp.lt.s32.totalorder %s682_s6, %s509_s27 }
  0x23   : > { %p506_p1 = pnand %p504_p13, %p490_p0  ;;  %p512_p3 = scmp.lt.s32.totalorder %s510_s28, %s503_s22 }
  0x25   : > { %p507_p11 = pneg %p506_p1  ;;  %p513_p4 = por %p512_p3, %p511_p10 }
  0x27   : > { %p514_p5 = pnand %p513_p4, %p507_p11 }
  0x29   : > { %517 = shalt.err (!%p514_p5)
}
  0x2a   : > { %s587_s29 = smov 128   ;;  %s588_s30 = smov 8  }
  0x2b   : > { %445 = dma.hbm_to_vmem [thread:$0]  (!%p678_p12), %s674_s4, 4096, %s682_s6, %s684_s8, %s587_s29, %s587_s29, %s588_s30  }
  0x2c   : > { %p426_p0 = scmp.ge.s32.totalorder %s584_s15, 1  ;;  %p156_p2 = scmp.lt.s32.totalorder %s584_s15, 9 }
  0x2e   : > { %p157_p7 = pnand %p426_p0, %p156_p2 }
  0x2f   : > { %s715_s5 = sand.u32 (!%p157_p7), 1, %s576_s13  }
  0x30   : > { %160 = sbr.rel (%p157_p7) target bundleno = 95 (0x5f), region = 32  ;;  %s427_s9 = sshll.u32 (!%p157_p7), %s715_s5, 8 }
  0x31   : > { %s163_s10 = scalar_lea.sflag (!%p157_p7), [#allocation3], %s715_s5  ;;  %s721_s11 = scalar_lea.vmem (!%p157_p7), [#allocation2], %s427_s9 }
  0x37   : > { %563 = dma.done.wait (%p655_p6), %s163_s10, 4096  }
  0x38   : > { %565 = vsyncadd (%p655_p6), %s163_s10, 4294963200  ;;  %v191_v0 = vld [vmem:[%s721_s11] sm:$0xff]  ;;  %v192_v4 = vld [vmem:[%s721_s11 + $0x8] sm:$0xff]  ;;  %s764_s23 = scalar_lea.vmem [#allocation5], %s427_s9  ;;  %s437_s17 = sshll.u32 %s633_s16, 12 }
  0x39   : > { %v731_v1 = vld [vmem:[%s920_s1] ss:$0 sm:$0xff]  ;;  %v193_v5 = vld [vmem:[%s721_s11 + $0x10] sm:$0xff]  ;;  %v194_v6 = vld [vmem:[%s721_s11 + $0x18] sm:$0xff]  ;;  %s347_s19 = sshll.u32 %s764_s23, 4  ;;  %s866_s22 = scalar_lea.hbm %s922_s3, %s437_s17  ;;  %s868_s19 = int_to_ptr.vmem [resolvable:$true] %s347_s19 }
  0x3a   : > { %v736_v2 = vld [vmem:[%s921_s2] ss:$0 sm:$0xff]  ;;  %v230_v3 = vmul.f32 %v731_v1, %v191_v0  ;;  %v231_v7 = vmul.f32 %v731_v1, %v192_v4  ;;  %v232_v8 = vmul.f32 %v731_v1, %v193_v5  ;;  %v233_v9 = vmul.f32 %v731_v1, %v194_v6  ;;  %v196_v11 = vld [vmem:[%s721_s11 + $0x28] sm:$0xff]  ;;  %v197_v12 = vld [vmem:[%s721_s11 + $0x30] sm:$0xff]  ;;  %s334_s26 = scalar_lea.sflag [#allocation4], %s715_s5  ;;  %s518_s27 = scalar_lea.vmem %s868_s19, 4096 }
  0x3b   : > { %v195_v10 = vld [vmem:[%s721_s11 + $0x20] sm:$0xff]  ;;  %v235_v15 = vmul.f32 %v731_v1, %v196_v11  ;;  %v236_v16 = vmul.f32 %v731_v1, %v197_v12  ;;  %v198_v17 = vld [vmem:[%s721_s11 + $0x38] sm:$0xff]  ;;  %v200_v19 = vld [vmem:[%s721_s11 + $0x48] sm:$0xff]  ;;  %p519_p6 = scmp.ne.s32.totalorder %s868_s19, %s518_s27  ;;  %p929_p10 = scmp.ne.s32.totalorder %s926_s24, 0 }
  0x3c   : > { %v269_v13 = vadd.f32 %v736_v2, %v230_v3  ;;  %v234_v14 = vmul.f32 %v731_v1, %v195_v10  ;;  %v199_v18 = vld [vmem:[%s721_s11 + $0x40] sm:$0xff]  ;;  %v270_v20 = vadd.f32 %v736_v2, %v231_v7  ;;  %v271_v21 = vadd.f32 %v736_v2, %v232_v8  ;;  %v201_v24 = vld [vmem:[%s721_s11 + $0x50] sm:$0xff]  ;;  %v202_v25 = vld [vmem:[%s721_s11 + $0x58] sm:$0xff]  ;;  %s589_s28 = smov [#allocation5]  }
  0x3d   : > { %v272_v22 = vadd.f32 %v736_v2, %v233_v9  ;;  %v237_v23 = vmul.f32 %v731_v1, %v198_v17  ;;  %v203_v26 = vld [vmem:[%s721_s11 + $0x60] sm:$0xff]  ;;  %v274_v28 = vadd.f32 %v736_v2, %v235_v15  ;;  %v275_v29 = vadd.f32 %v736_v2, %v236_v16  ;;  %v204_v31 = vld [vmem:[%s721_s11 + $0x68] sm:$0xff]  ;;  %v205_v32 = vld [vmem:[%s721_s11 + $0x70] sm:$0xff]  ;;  %p520_p11 = pnand %p519_p6, %p929_p10  ;;  %s522_s29 = sshll.u32 %s589_s28, 4  ;;  %s523_s29 = int_to_ptr.vmem [resolvable:$false] %s522_s29 }
  0x3e   : > { %301 = vst [vmem:[%s764_s23] sm:$0xff] %v269_v13  ;;  %v273_v27 = vadd.f32 %v736_v2, %v234_v14  ;;  %v238_v30 = vmul.f32 %v731_v1, %v199_v18  ;;  %v206_v33 = vld [vmem:[%s721_s11 + $0x78] sm:$0xff]  ;;  %302 = vst [vmem:[%s764_s23 + $0x8] sm:$0xff] %v270_v20  ;;  %v239_v35 = vmul.f32 %v731_v1, %v200_v19  ;;  %v207_v38 = vld [vmem:[%s721_s11 + $0x80] sm:$0xff]  ;;  %s524_s30 = scalar_lea.vmem %s523_s29, 8192  ;;  %p525_p8 = scmp.lt.s32.totalorder %s868_s19, %s523_s29 }
  0x3f   : > { %303 = vst [vmem:[%s764_s23 + $0x10] sm:$0xff] %v271_v21  ;;  %304 = vst [vmem:[%s764_s23 + $0x18] sm:$0xff] %v272_v22  ;;  %v276_v34 = vadd.f32 %v736_v2, %v237_v23  ;;  %v240_v36 = vmul.f32 %v731_v1, %v201_v24  ;;  %v241_v37 = vmul.f32 %v731_v1, %v202_v25  ;;  %v208_v43 = vld [vmem:[%s721_s11 + $0x88] sm:$0xff]  ;;  %v209_v44 = vld [vmem:[%s721_s11 + $0x90] sm:$0xff]  ;;  %p521_p12 = pneg %p520_p11  ;;  %p526_p9 = scmp.lt.s32.totalorder %s524_s30, %s518_s27 }
  0x40   : > { %305 = vst [vmem:[%s764_s23 + $0x20] sm:$0xff] %v273_v27  ;;  %306 = vst [vmem:[%s764_s23 + $0x28] sm:$0xff] %v274_v28  ;;  %v277_v39 = vadd.f32 %v736_v2, %v238_v30  ;;  %v242_v40 = vmul.f32 %v731_v1, %v203_v26  ;;  %v243_v41 = vmul.f32 %v731_v1, %v204_v31  ;;  %v210_v45 = vld [vmem:[%s721_s11 + $0x98] sm:$0xff]  ;;  %v211_v50 = vld [vmem:[%s721_s11 + $0xa0] sm:$0xff] }
  0x41   : > { %307 = vst [vmem:[%s764_s23 + $0x30] sm:$0xff] %v275_v29  ;;  %v244_v42 = vmul.f32 %v731_v1, %v205_v32  ;;  %308 = vst [vmem:[%s764_s23 + $0x38] sm:$0xff] %v276_v34  ;;  %v278_v46 = vadd.f32 %v736_v2, %v239_v35  ;;  %v279_v47 = vadd.f32 %v736_v2, %v240_v36  ;;  %v212_v51 = vld [vmem:[%s721_s11 + $0xa8] sm:$0xff]  ;;  %v213_v52 = vld [vmem:[%s721_s11 + $0xb0] sm:$0xff]  ;;  %p527_p13 = por %p526_p9, %p525_p8 }
  0x42   : > { %v280_v48 = vadd.f32 %v736_v2, %v241_v37  ;;  %v245_v49 = vmul.f32 %v731_v1, %v206_v33  ;;  %309 = vst [vmem:[%s764_s23 + $0x40] sm:$0xff] %v277_v39  ;;  %v281_v53 = vadd.f32 %v736_v2, %v242_v40  ;;  %v282_v54 = vadd.f32 %v736_v2, %v243_v41  ;;  %v214_v57 = vld [vmem:[%s721_s11 + $0xb8] sm:$0xff]  ;;  %v215_v62 = vld [vmem:[%s721_s11 + $0xc0] sm:$0xff]  ;;  %v216_v5 = vld [vmem:[%s721_s11 + $0xc8] sm:$0xff] }
  0x43   : > { %v283_v55 = vadd.f32 %v736_v2, %v244_v42  ;;  %v246_v56 = vmul.f32 %v731_v1, %v207_v38  ;;  %310 = vst [vmem:[%s764_s23 + $0x48] sm:$0xff] %v278_v46  ;;  %311 = vst [vmem:[%s764_s23 + $0x50] sm:$0xff] %v279_v47  ;;  %v247_v59 = vmul.f32 %v731_v1, %v208_v43  ;;  %v217_v6 = vld [vmem:[%s721_s11 + $0xd0] sm:$0xff]  ;;  %v218_v7 = vld [vmem:[%s721_s11 + $0xd8] sm:$0xff]  ;;  %p528_p1 = pnand %p527_p13, %p521_p12 }
  0x44   : > { %312 = vst [vmem:[%s764_s23 + $0x58] sm:$0xff] %v280_v48  ;;  %v284_v58 = vadd.f32 %v736_v2, %v245_v49  ;;  %v248_v60 = vmul.f32 %v731_v1, %v209_v44  ;;  %v249_v61 = vmul.f32 %v731_v1, %v210_v45  ;;  %313 = vst [vmem:[%s764_s23 + $0x60] sm:$0xff] %v281_v53  ;;  %v219_v12 = vld [vmem:[%s721_s11 + $0xe0] sm:$0xff]  ;;  %v220_v13 = vld [vmem:[%s721_s11 + $0xe8] sm:$0xff] }
  0x45   : > { %314 = vst [vmem:[%s764_s23 + $0x68] sm:$0xff] %v282_v54  ;;  %315 = vst [vmem:[%s764_s23 + $0x70] sm:$0xff] %v283_v55  ;;  %v285_v63 = vadd.f32 %v736_v2, %v246_v56  ;;  %v250_v0 = vmul.f32 %v731_v1, %v211_v50  ;;  %v251_v3 = vmul.f32 %v731_v1, %v212_v51  ;;  %v221_v14 = vld [vmem:[%s721_s11 + $0xf0] sm:$0xff]  ;;  %v222_v19 = vld [vmem:[%s721_s11 + $0xf8] sm:$0xff] }
  0x46   : > { %v252_v4 = vmul.f32 %v731_v1, %v213_v52  ;;  %316 = vst [vmem:[%s764_s23 + $0x78] sm:$0xff] %v284_v58  ;;  %v286_v8 = vadd.f32 %v736_v2, %v247_v59  ;;  %v287_v9 = vadd.f32 %v736_v2, %v248_v60  ;;  %v288_v10 = vadd.f32 %v736_v2, %v249_v61 }
  0x47   : > { %v253_v11 = vmul.f32 %v731_v1, %v214_v57  ;;  %317 = vst [vmem:[%s764_s23 + $0x80] sm:$0xff] %v285_v63  ;;  %v289_v15 = vadd.f32 %v736_v2, %v250_v0  ;;  %v290_v16 = vadd.f32 %v736_v2, %v251_v3  ;;  %v254_v18 = vmul.f32 %v731_v1, %v215_v62 }
  0x48   : > { %v291_v17 = vadd.f32 %v736_v2, %v252_v4  ;;  %318 = vst [vmem:[%s764_s23 + $0x88] sm:$0xff] %v286_v8  ;;  %319 = vst [vmem:[%s764_s23 + $0x90] sm:$0xff] %v287_v9  ;;  %v255_v21 = vmul.f32 %v731_v1, %v216_v5  ;;  %v256_v22 = vmul.f32 %v731_v1, %v217_v6 }
  0x49   : > { %320 = vst [vmem:[%s764_s23 + $0x98] sm:$0xff] %v288_v10  ;;  %v292_v20 = vadd.f32 %v736_v2, %v253_v11  ;;  %v257_v23 = vmul.f32 %v731_v1, %v218_v7  ;;  %321 = vst [vmem:[%s764_s23 + $0xa0] sm:$0xff] %v289_v15  ;;  %v293_v24 = vadd.f32 %v736_v2, %v254_v18 }
  0x4a   : > { %322 = vst [vmem:[%s764_s23 + $0xa8] sm:$0xff] %v290_v16  ;;  %323 = vst [vmem:[%s764_s23 + $0xb0] sm:$0xff] %v291_v17  ;;  %v258_v25 = vmul.f32 %v731_v1, %v219_v12  ;;  %v259_v26 = vmul.f32 %v731_v1, %v220_v13  ;;  %v260_v27 = vmul.f32 %v731_v1, %v221_v14 }
  0x4b   : > { %324 = vst [vmem:[%s764_s23 + $0xb8] sm:$0xff] %v292_v20  ;;  %v294_v28 = vadd.f32 %v736_v2, %v255_v21  ;;  %v295_v29 = vadd.f32 %v736_v2, %v256_v22  ;;  %v296_v30 = vadd.f32 %v736_v2, %v257_v23  ;;  %v261_v31 = vmul.f32 %v731_v1, %v222_v19 }
  0x4c   : > { %325 = vst [vmem:[%s764_s23 + $0xc0] sm:$0xff] %v293_v24  ;;  %v297_v32 = vadd.f32 %v736_v2, %v258_v25  ;;  %v298_v33 = vadd.f32 %v736_v2, %v259_v26  ;;  %v299_v34 = vadd.f32 %v736_v2, %v260_v27 }
  0x4d   : > { %326 = vst [vmem:[%s764_s23 + $0xc8] sm:$0xff] %v294_v28  ;;  %327 = vst [vmem:[%s764_s23 + $0xd0] sm:$0xff] %v295_v29  ;;  %v300_v1 = vadd.f32 %v736_v2, %v261_v31 }
  0x4e   : > { %328 = vst [vmem:[%s764_s23 + $0xd8] sm:$0xff] %v296_v30  ;;  %329 = vst [vmem:[%s764_s23 + $0xe0] sm:$0xff] %v297_v32 }
  0x4f   : > { %330 = vst [vmem:[%s764_s23 + $0xe8] sm:$0xff] %v298_v33  ;;  %331 = vst [vmem:[%s764_s23 + $0xf0] sm:$0xff] %v299_v34 }
  0x50   : > { %332 = vst [vmem:[%s764_s23 + $0xf8] sm:$0xff] %v300_v1 }
  0x51   : > { %531 = shalt.err (!%p528_p1)
}
  0x52   : > { %s532_s9 = scalar_lea.hbm %s866_s22, 4096  ;;  %s536_s4 = scalar_lea.hbm %s922_s3, 32768 }
  0x53   : > { %p533_p3 = scmp.ne.s32.totalorder %s866_s22, %s532_s9  ;;  %p537_p0 = scmp.lt.u32.totalorder %s866_s22, %s922_s3 }
  0x54   : > { %p538_p2 = scmp.lt.u32.totalorder %s536_s4, %s532_s9  ;;  %p540_p6 = scmp.lt.u32.totalorder %s532_s9, %s866_s22 }
  0x55   : > { %p534_p4 = pnand %p533_p3, %p929_p10 }
  0x56   : > { %p539_p7 = por %p538_p2, %p537_p0 }
  0x57   : > { %p535_p5 = pneg %p534_p4 }
  0x58   : > { %p541_p11 = por %p540_p6, %p539_p7 }
  0x5a   : > { %p542_p12 = pnand %p541_p11, %p535_p5 }
  0x5c   : > { %545 = shalt.err (!%p542_p12)
}
  0x5d   : > { %s590_s8 = smov 128   ;;  %s591_s23 = smov 8  }
  0x5e   : > { %440 = dma.vmem_to_hbm [thread:$0]  (%p929_p10), %s868_s19, 4096, %s866_s22, %s334_s26, %s590_s8, %s590_s8, %s591_s23  }
  0x5f PF: > { %p451_p8 = scmp.ge.s32.totalorder %s584_s15, 2  ;;  %s362_s17 = sand.u32 1, %s572_s12  }
  0x60   : > { %p930_p9 = scmp.ne.s32.totalorder %s927_s25, 0  ;;  %s363_s16 = scalar_lea.sflag [#allocation4], %s362_s17 }
  0x62   : > { %p447_p13 = pnand %p451_p8, %p930_p9 }
  0x64   : > { %567 = dma.done.wait (!%p447_p13), %s363_s16, 4096  }
  0x65   : > { %569 = vsyncadd (!%p447_p13), %s363_s16, 4294963200  ;;  %p16_p1 = scmp.ge.s32.totalorder %s637_s18, 10   ;;  %s931_s12 = smov %s576_s13 }
  0x66   : > { %s932_s13 = smov %s580_s14  ;;  %s933_s14 = smov %s649_s21 }
  0x67   : > { %s934_s15 = smov %s637_s18  ;;  %18 = sbr.rel (!%p16_p1) target bundleno = 5 (0x5), region = 77 }
  0x6e   :  { %368 = vsyncpa [#allocation3], 1 }
  0x6f   :  { %370 = vsyncpa [#allocation3 + $0x1], 1 }
  0x70   :  { %371 = vsyncpa [#allocation4], 1 }
  0x71   :  { %373 = vsyncpa [#allocation4 + $0x1], 1 }

</bundles_post_ra>
